<compile_context>
chip_gen: v7x
topology: tpu7x:2x2x1
jax: 0.10.0
libtpu: 0.0.40
codegen_flags: <defaults>
</compile_context>

<pallas_src>
import functools

import jax
import jax.numpy as jnp
from jax.experimental import pallas as pl
from jax.experimental.pallas import tpu as pltpu


def _round_up(v, m):
    return (v + m - 1) // m * m


# -----------------------------------------------------------------------------
# Per-generation tuning: scoped-VMEM budget and minimum number of row tiles.
# -----------------------------------------------------------------------------
def _device_tuning():
    try:
        kind = jax.devices()[0].device_kind.lower()
    except Exception:  # pragma: no cover - defensive
        kind = ""
    if "v5" in kind or "v6" in kind:
        # 128 MiB physical VMEM; raise the scoped limit well past the 16/32 MiB default.
        return 64 * 1024 * 1024, 1
    # v7x (64 MiB physical, 2 TensorCores) or unknown -> conservative budget;
    # on v7x require >= 2 row tiles so the "parallel" axis shards across both TCs.
    min_tiles = 2 if "7" in kind else 1
    return 40 * 1024 * 1024, min_tiles


# -----------------------------------------------------------------------------
# Fused kernel: one row tile of  h = x @ W0^T + b0 ; repeat: h = relu(h) @ W^T + b
# Everything after loading the x tile stays on-chip; h is stored to HBM once.
# -----------------------------------------------------------------------------
def _ann_fused_kernel(*refs, n_layers):
    if n_layers > 1:
        x_ref, w0t_ref, b0_ref, wt_ref, b_ref, o_ref = refs
    else:
        x_ref, w0t_ref, b0_ref, o_ref = refs
        wt_ref = b_ref = None

    # Cast x to the MXU operand dtype in-VMEM (no separate HBM pass).
    xa = x_ref[...].astype(w0t_ref.dtype)
    h = jnp.dot(xa, w0t_ref[...], preferred_element_type=jnp.float32)
    h = h + b0_ref[...]

    if n_layers > 1:
        wt = wt_ref[...]                             # small VMEM-resident weight
        bb = jnp.broadcast_to(b_ref[...], h.shape)   # hoisted: one broadcast only
        # static, tiny trip count -> unrolled; h never leaves VMEM between layers
        for _ in range(n_layers - 1):
            a = jnp.maximum(h, 0.0).astype(wt.dtype)
            h = jnp.dot(a, wt, preferred_element_type=jnp.float32) + bb

    o_ref[...] = h.astype(o_ref.dtype)


# -----------------------------------------------------------------------------
# Wrapper: row tiling with partial last tile, column-only lane padding, one call.
# -----------------------------------------------------------------------------
def ann_forward(x, params, n_ANNlayers=1, *, tile_rows=512,
                compute_dtype=jnp.bfloat16, out_dtype=None):
    """x: (..., input_size) -> (..., reduced_size).  Dropout = identity (eval)."""
    lead = x.shape[:-1]
    Din = x.shape[-1]
    w0_t, b0 = params["w0_t"], params["b0"]
    Dout = w0_t.shape[1]
    out_dtype = x.dtype if out_dtype is None else out_dtype

    x2d = x.reshape(-1, Din)
    R = x2d.shape[0]

    # Lane-dense output column count.  The contraction dim (Din) and the row dim
    # are never padded; only the small weight/bias tensors get column padding.
    Dc = Dout if Dout % 128 == 0 else _round_up(Dout, 128)

    budget, min_tiles = _device_tuning()
    isz_x = jnp.dtype(x.dtype).itemsize
    isz_w = jnp.dtype(compute_dtype).itemsize
    isz_o = jnp.dtype(out_dtype).itemsize

    # ---- row-tile selection (itemsize- and weight-aware VMEM accounting) ----
    if R <= 8:
        TM = R
    else:
        w_elems = Din * Dc + (Dc * Dc if n_ANNlayers > 1 else 0)
        fixed = 2 * isz_w * w_elems + 2 * 4 * 2 * Dc   # weights (<=2 bufs) + biases
        per_row = 2 * (Din * isz_x + Dc * isz_o)       # double-buffered x / out tiles
        per_row += Dc * (4 + isz_w)                    # f32 accumulator + cast temp
        avail = int(budget * 0.85) - fixed
        tm_budget = max(8, (avail // per_row) // 8 * 8)
        TM = min(max(8, _round_up(tile_rows, 8)), tm_budget, _round_up(R, 8))
        if min_tiles > 1:
            TM = min(TM, _round_up(pl.cdiv(R, min_tiles), 8))
        TM = max(8, (TM // 8) * 8)
    grid = (pl.cdiv(R, TM),)

    # Small weights/biases: cast (+ zero column padding when Dout not lane-aligned).
    # Zero padding keeps the math exact: padded output columns get zero weights and
    # zero bias (and relu(0)=0), so they stay zero through every fused layer.
    w0_p = w0_t.astype(compute_dtype)
    b0_p = b0.astype(jnp.float32)
    if Dc != Dout:
        w0_p = jnp.pad(w0_p, ((0, 0), (0, Dc - Dout)))
        b0_p = jnp.pad(b0_p, ((0, 0), (0, Dc - Dout)))
    args = [x2d, w0_p, b0_p]
    if n_ANNlayers > 1:
        w_p = params["w_t"].astype(compute_dtype)
        b_p = params["b"].astype(jnp.float32)
        if Dc != Dout:
            w_p = jnp.pad(w_p, ((0, Dc - Dout), (0, Dc - Dout)))
            b_p = jnp.pad(b_p, ((0, 0), (0, Dc - Dout)))
        args += [w_p, b_p]

    flops = 2 * R * Din * Dc + max(0, n_ANNlayers - 1) * 2 * R * Dc * Dc
    bytes_accessed = (R * Din * isz_x + R * Dc * isz_o
                      + isz_w * (Din * Dc + (Dc * Dc if n_ANNlayers > 1 else 0)))

    def _const_spec(shape, single_buffer):
        if single_buffer:
            # constant index_map -> DMA'd once; 1 buffer is enough (saves VMEM).
            return pl.BlockSpec(shape, lambda i: (0, 0),
                                pipeline_mode=pl.Buffered(1))
        return pl.BlockSpec(shape, lambda i: (0, 0))

    def _run(single_buffer_weights):
        in_specs = [
            pl.BlockSpec((TM, Din), lambda i: (i, 0)),           # streamed row tiles
            _const_spec((Din, Dc), single_buffer_weights),        # resident W0^T
            _const_spec((1, Dc), single_buffer_weights),          # resident b0
        ]
        if n_ANNlayers > 1:
            in_specs += [_const_spec((Dc, Dc), single_buffer_weights),
                         _const_spec((1, Dc), single_buffer_weights)]
        return pl.pallas_call(
            functools.partial(_ann_fused_kernel, n_layers=n_ANNlayers),
            out_shape=jax.ShapeDtypeStruct((R, Dc), out_dtype),
            grid=grid,
            in_specs=in_specs,
            out_specs=pl.BlockSpec((TM, Dc), lambda i: (i, 0)),
            compiler_params=pltpu.CompilerParams(
                dimension_semantics=("parallel",),        # row tiles independent
                vmem_limit_bytes=int(budget)),
            cost_estimate=pl.CostEstimate(
                flops=int(flops), transcendentals=0,
                bytes_accessed=int(bytes_accessed)),
        )(*args)

    try:
        out = _run(True)
    except Exception:
        # pl.Buffered(1) not supported on this jax build -> default double buffering.
        out = _run(False)

    if Dc != Dout:
        out = out[:, :Dout]
    return out.reshape(*lead, Dout)


# -----------------------------------------------------------------------------
# Deterministic parameter init (PyTorch nn.Linear-style uniform(-1/sqrt(fan_in)))
# -----------------------------------------------------------------------------
def init_params(key, input_size, reduced_size):
    k0, k1, k2, k3 = jax.random.split(key, 4)
    bound0 = 1.0 / jnp.sqrt(input_size)
    bound1 = 1.0 / jnp.sqrt(reduced_size)
    # stored transposed: (in, out)
    w0_t = jax.random.uniform(k0, (input_size, reduced_size), jnp.float32,
                              -bound0, bound0)
    b0 = jax.random.uniform(k1, (1, reduced_size), jnp.float32, -bound0, bound0)
    w_t = jax.random.uniform(k2, (reduced_size, reduced_size), jnp.float32,
                             -bound1, bound1)
    b = jax.random.uniform(k3, (1, reduced_size), jnp.float32, -bound1, bound1)
    return {"w0_t": w0_t, "b0": b0, "w_t": w_t, "b": b}


def _reference_forward(x, params, n_ANNlayers):
    # TODO(synk): dropout is identity (eval mode); stochastic dropout not reproduced.
    h = x.reshape(-1, x.shape[-1]) @ params["w0_t"] + params["b0"]
    for _ in range(n_ANNlayers - 1):
        h = jnp.maximum(h, 0.0) @ params["w_t"] + params["b"]
    return h.reshape(*x.shape[:-1], -1)


if __name__ == "__main__":
    # Small shapes consistent with the module: (batch, seq, input_size)
    batch, seq = 2, 8
    input_size, reduced_size = 256, 128

    key = jax.random.PRNGKey(0)
    kx, kp, kx2, kp2 = jax.random.split(key, 4)
    x = jax.random.normal(kx, (batch, seq, input_size), jnp.float32)
    params = init_params(kp, input_size, reduced_size)

    # 1) default config (n_ANNlayers=1) == fc0 only; tile_rows=8 exercises a
    #    multi-tile ("parallel") row grid even at this small size. f32 operands.
    out1 = jax.block_until_ready(
        ann_forward(x, params, n_ANNlayers=1, tile_rows=8,
                    compute_dtype=jnp.float32))
    ref1 = _reference_forward(x, params, 1)
    assert out1.shape == (batch, seq, reduced_size)
    assert jnp.allclose(out1, ref1, atol=1e-4, rtol=1e-4)

    # 2) fused multi-layer path (n_ANNlayers=3), f32 operands, single pallas_call.
    out2 = jax.block_until_ready(
        ann_forward(x, params, n_ANNlayers=3, compute_dtype=jnp.float32))
    ref2 = _reference_forward(x, params, 3)
    assert out2.shape == (batch, seq, reduced_size)
    assert jnp.allclose(out2, ref2, atol=1e-4, rtol=1e-4)

    # 3) default bf16 MXU operands with f32 accumulation (native matmul dtype).
    out3 = jax.block_until_ready(ann_forward(x, params, n_ANNlayers=3))
    assert jnp.allclose(out3, ref2, atol=1e-1, rtol=1e-1)

    # 4) non-128-aligned feature dims + non-divisible row count (R=21) exercise
    #    the column-only lane padding and the masked partial last row tile.
    in_b, red_b = 72, 48
    x_b = jax.random.normal(kx2, (3, 7, in_b), jnp.float32)
    params_b = init_params(kp2, in_b, red_b)
    out4 = jax.block_until_ready(
        ann_forward(x_b, params_b, n_ANNlayers=2, tile_rows=8,
                    compute_dtype=jnp.float32))
    ref4 = _reference_forward(x_b, params_b, 2)
    assert out4.shape == (3, 7, red_b)
    assert jnp.allclose(out4, ref4, atol=1e-4, rtol=1e-4)

    print("KERNEL_OK")
</pallas_src>

<mosaic_0001>
module attributes {stable_mosaic.version = 11 : i64} {
  func.func @_ann_fused_kernel(%arg0: i32, %arg1: memref<8x256xf32, #tpu.memory_space<vmem>>, %arg2: memref<256x128xf32, #tpu.memory_space<vmem>>, %arg3: memref<1x128xf32, #tpu.memory_space<vmem>>, %arg4: memref<8x128xf32, #tpu.memory_space<vmem>>) attributes {dimension_semantics = [#tpu.dimension_semantics<parallel>], iteration_bounds = array<i64: 2>, scalar_prefetch = 0 : i64, scratch_operands = 0 : i64, tpu.core_type = #tpu.core_type<tc>, window_params = [{transform_indices = @transform_0, window_bounds = array<i64: 8, 256>}, {pipeline_mode = #tpu.pipeline_mode<synchronous>, transform_indices = @transform_1, window_bounds = array<i64: 256, 128>}, {pipeline_mode = #tpu.pipeline_mode<synchronous>, transform_indices = @transform_2, window_bounds = array<i64: 1, 128>}, {transform_indices = @transform_3, window_bounds = array<i64: 8, 128>}]} {
    %c0 = arith.constant 0 : index
    %c0_0 = arith.constant 0 : index
    %0 = vector.load %arg1[%c0, %c0_0] : memref<8x256xf32, #tpu.memory_space<vmem>>, vector<8x256xf32>
    %c0_1 = arith.constant 0 : index
    %c0_2 = arith.constant 0 : index
    %1 = vector.load %arg2[%c0_1, %c0_2] : memref<256x128xf32, #tpu.memory_space<vmem>>, vector<256x128xf32>
    %cst = arith.constant dense<0.000000e+00> : vector<8x128xf32>
    %2 = tpu.matmul %0, %1, %cst {dimension_numbers = #tpu.dot_dimension_numbers<[1], [0], [0], [1], [0, 0, 1, 1], [], []>} : vector<8x256xf32>, vector<256x128xf32>, vector<8x128xf32> -> vector<8x128xf32>
    %c0_3 = arith.constant 0 : index
    %c0_4 = arith.constant 0 : index
    %3 = vector.load %arg3[%c0_3, %c0_4] : memref<1x128xf32, #tpu.memory_space<vmem>>, vector<1x128xf32>
    %4 = vector.broadcast %3 : vector<1x128xf32> to vector<8x128xf32>
    %5 = arith.addf %2, %4 : vector<8x128xf32>
    %c0_5 = arith.constant 0 : index
    %c0_6 = arith.constant 0 : index
    %6 = vector.load %arg4[%c0_5, %c0_6] : memref<8x128xf32, #tpu.memory_space<vmem>>, vector<8x128xf32>
    tpu.vector_store %arg4[%c0_5, %c0_6], %5 {strides = array<i32>} : memref<8x128xf32, #tpu.memory_space<vmem>>, vector<8x128xf32>,
    return
  }
  func.func @transform_0(%arg0: i32) -> (i32, i32) {
    %c0_i32 = arith.constant 0 : i32
    %c0_i32_0 = arith.constant 0 : i32
    return %arg0, %c0_i32 : i32, i32
  }
  func.func @transform_1(%arg0: i32) -> (i32, i32) {
    %c0_i32 = arith.constant 0 : i32
    %c0_i32_0 = arith.constant 0 : i32
    %c0_i32_1 = arith.constant 0 : i32
    return %c0_i32, %c0_i32_0 : i32, i32
  }
  func.func @transform_2(%arg0: i32) -> (i32, i32) {
    %c0_i32 = arith.constant 0 : i32
    %c0_i32_0 = arith.constant 0 : i32
    %c0_i32_1 = arith.constant 0 : i32
    return %c0_i32, %c0_i32_0 : i32, i32
  }
  func.func @transform_3(%arg0: i32) -> (i32, i32) {
    %c0_i32 = arith.constant 0 : i32
    %c0_i32_0 = arith.constant 0 : i32
    return %arg0, %c0_i32 : i32, i32
  }
}

module attributes {stable_mosaic.version = 11 : i64} {
  func.func @_ann_fused_kernel(%arg0: i32, %arg1: memref<8x256xf32, #tpu.memory_space<vmem>>, %arg2: memref<256x128xf32, #tpu.memory_space<vmem>>, %arg3: memref<1x128xf32, #tpu.memory_space<vmem>>, %arg4: memref<8x128xf32, #tpu.memory_space<vmem>>) attributes {dimension_semantics = [#tpu.dimension_semantics<parallel>], iteration_bounds = array<i64: 2>, scalar_prefetch = 0 : i64, scratch_operands = 0 : i64, tpu.core_type = #tpu.core_type<tc>, window_params = [{transform_indices = @transform_0, window_bounds = array<i64: 8, 256>}, {pipeline_mode = #tpu.pipeline_mode<synchronous>, transform_indices = @transform_1, window_bounds = array<i64: 256, 128>}, {pipeline_mode = #tpu.pipeline_mode<synchronous>, transform_indices = @transform_2, window_bounds = array<i64: 1, 128>}, {transform_indices = @transform_3, window_bounds = array<i64: 8, 128>}]} {
    %c0 = arith.constant 0 : index
    %c0_0 = arith.constant 0 : index
    %0 = vector.load %arg1[%c0, %c0_0] : memref<8x256xf32, #tpu.memory_space<vmem>>, vector<8x256xf32>
    %c0_1 = arith.constant 0 : index
    %c0_2 = arith.constant 0 : index
    %1 = vector.load %arg2[%c0_1, %c0_2] : memref<256x128xf32, #tpu.memory_space<vmem>>, vector<256x128xf32>
    %cst = arith.constant dense<0.000000e+00> : vector<8x128xf32>
    %2 = tpu.matmul %0, %1, %cst {dimension_numbers = #tpu.dot_dimension_numbers<[1], [0], [0], [1], [0, 0, 1, 1], [], []>} : vector<8x256xf32>, vector<256x128xf32>, vector<8x128xf32> -> vector<8x128xf32>
    %c0_3 = arith.constant 0 : index
    %c0_4 = arith.constant 0 : index
    %3 = vector.load %arg3[%c0_3, %c0_4] : memref<1x128xf32, #tpu.memory_space<vmem>>, vector<1x128xf32>
    %4 = vector.broadcast %3 : vector<1x128xf32> to vector<8x128xf32>
    %5 = arith.addf %2, %4 : vector<8x128xf32>
    %c0_5 = arith.constant 0 : index
    %c0_6 = arith.constant 0 : index
    %6 = vector.load %arg4[%c0_5, %c0_6] : memref<8x128xf32, #tpu.memory_space<vmem>>, vector<8x128xf32>
    tpu.vector_store %arg4[%c0_5, %c0_6], %5 {strides = array<i32>} : memref<8x128xf32, #tpu.memory_space<vmem>>, vector<8x128xf32>,
    return
  }
  func.func @transform_0(%arg0: i32) -> (i32, i32) {
    %c0_i32 = arith.constant 0 : i32
    %c0_i32_0 = arith.constant 0 : i32
    return %arg0, %c0_i32 : i32, i32
  }
  func.func @transform_1(%arg0: i32) -> (i32, i32) {
    %c0_i32 = arith.constant 0 : i32
    %c0_i32_0 = arith.constant 0 : i32
    %c0_i32_1 = arith.constant 0 : i32
    return %c0_i32, %c0_i32_0 : i32, i32
  }
  func.func @transform_2(%arg0: i32) -> (i32, i32) {
    %c0_i32 = arith.constant 0 : i32
    %c0_i32_0 = arith.constant 0 : i32
    %c0_i32_1 = arith.constant 0 : i32
    return %c0_i32, %c0_i32_0 : i32, i32
  }
  func.func @transform_3(%arg0: i32) -> (i32, i32) {
    %c0_i32 = arith.constant 0 : i32
    %c0_i32_0 = arith.constant 0 : i32
    return %arg0, %c0_i32 : i32, i32
  }
}

</mosaic_0001>

<bundles_post_ra>
// kernel: tpu_custom_call.1
= control target key start
LH: loop header
LB: loop body
LE: loop exit
PB: predicated region body
PF: predicated region fallthrough
CT: control target
= control target key end

     0   :  { %8 = vsyncpa [#allocation3], 0  ;;  %s910_s0 = inlined_call_operand.hbm [shape: f32[16,256], index: 0, kind: input, shape index: {}]   ;;  %s911_s1 = inlined_call_operand.hbm [shape: f32[256,128], index: 1, kind: input, shape index: {}]   ;;  %s912_s2 = inlined_call_operand.vmem [shape: f32[1,128], index: 2, kind: input, shape index: {}]   ;;  %s913_s3 = inlined_call_operand.hbm [shape: f32[16,128], index: 3, kind: output, shape index: {}]  }
   0x1   :  { %10 = vsyncpa [#allocation3 + $0x1], 0 }
   0x2   :  { %11 = vsyncpa [#allocation6], 0 }
   0x3   :  { %12 = vsyncpa [#allocation4], 0 }
   0x4   :  { %14 = vsyncpa [#allocation4 + $0x1], 0  ;;  %s706_s12 = smov 0   ;;  %s708_s13 = smov 0  }
   0x5   :  { %s710_s14 = smov 0   ;;  %s712_s15 = smov 0  }
   0x6 LB: > { %s727_s16 = sadd.s32 4294967295, %s679_s15   ;;  %s408_s17 = sadd.s32 4294967294, %s679_s15   ;;  %s679_s15 = sphi %s712_s15, %s933_s15   ;;  %s675_s14 = sphi %s710_s14, %s932_s14   ;;  %s671_s13 = sphi %s708_s13, %s931_s13   ;;  %s667_s12 = sphi %s706_s12, %s930_s12  }
   0x7   : > { %p40_p0 = scmp.ne.s32.totalorder %s671_s13, %s667_s12  ;;  %p914_p1 = scmp.eq.s32.totalorder %s727_s16, 0 }
   0x8   : > { %p112_p3 = scmp.eq.s32.totalorder %s408_s17, 1  ;;  %p409_p5 = scmp.ge.s32.totalorder %s679_s15, 1 }
   0x9   : > { %p736_p4 = por %p914_p1, %p40_p0  ;;  %p119_p7 = scmp.lt.s32.totalorder %s679_s15, 3 }
   0xa   : > { %p741_p6 = por %p112_p3, %p40_p0  ;;  %s681_s21 = smov [#allocation5]  }
   0xb   : > { %s917_s18 = scalar_select %p736_p4, 1, 0 }
   0xc   : > { %s918_s19 = scalar_select %p741_p6, 1, 0 }
   0xd   : > { %p746_p8 = pnand %p409_p5, %p119_p7  ;;  %s131_s22 = sshll.u32 %s681_s21, 4  ;;  %s750_s22 = int_to_ptr.vmem [resolvable:$true] %s131_s22 }
   0xe   : > { %s762_s24 = sadd.s32 1, %s679_s15   ;;  %s27_s25 = sadd.s32 1, %s675_s14 }
   0xf   : > { %s919_s20 = scalar_select %p746_p8, 1, 0 }
  0x10   : > { %p500_p9 = pneg %p746_p8  ;;  %s24_s26 = ssub.s32 %s679_s15, %s762_s24 }
  0x11   : > { %s551_s29 = scalar_lea.hbm %s911_s1, 4096 }
  0x12   : > { %p757_p11 = pnand %p500_p9, %p914_p1  ;;  %p552_p12 = scmp.ne.s32.totalorder %s911_s1, %s551_s29 }
  0x13   : > { %p558_p5 = scmp.lt.u32.totalorder %s551_s29, %s911_s1 }
  0x14   : > { %p553_p13 = pneg %p757_p11 }
  0x16   : > { %p554_p0 = pnand %p553_p13, %p552_p12 }
  0x18   : > { %p555_p3 = pneg %p554_p0 }
  0x1a   : > { %p560_p7 = pnand %p558_p5, %p555_p3 }
  0x1c   : > { %563 = shalt.err (!%p560_p7)
}
  0x1d   : > { %s564_s7 = scalar_lea.vmem %s750_s22, 4096  ;;  %p572_p2 = scmp.lt.s32.totalorder %s750_s22, %s750_s22 }
  0x1e   : > { %p565_p9 = scmp.ne.s32.totalorder %s750_s22, %s564_s7  ;;  %p573_p6 = scmp.lt.s32.totalorder %s564_s7, %s564_s7 }
  0x20   : > { %p567_p10 = pnand %p565_p9, %p553_p13  ;;  %p574_p4 = por %p573_p6, %p572_p2 }
  0x22   : > { %p568_p1 = pneg %p567_p10 }
  0x24   : > { %p575_p8 = pnand %p574_p4, %p568_p1 }
  0x26   : > { %578 = shalt.err (!%p575_p8)
}
  0x27   : > { %s682_s8 = smov 128   ;;  %s683_s9 = smov 8  }
  0x28   : > { %503 = dma.hbm_to_vmem [thread:$0]  (!%p757_p11), %s911_s1, 4096, %s750_s22, [#allocation6], %s682_s8, %s682_s8, %s683_s9  }
  0x29   : > { %p25_p2 = scmp.eq.s32.totalorder %s24_s26, 0  ;;  %p34_p1 = scmp.ne.s32.totalorder %s675_s14, %s671_s13 }
  0x2a   : > { %p35_p4 = scmp.eq.s32.totalorder %s679_s15, 0  ;;  %p513_p6 = scmp.lt.s32.totalorder %s679_s15, 2 }
  0x2b   : > { %s793_s17 = scalar_select %p25_p2, %s675_s14, %s27_s25  }
  0x2c   : > { %p36_p8 = por %p35_p4, %p34_p1  ;;  %p921_p10 = scmp.eq.s32.totalorder %s727_s16, 1 }
  0x2d   : > { %s148_s27 = sand.u32 1, %s675_s14   ;;  %s424_s28 = sshll.u32 %s679_s15, 8 }
  0x2e   : > { %p797_p12 = por %p921_p10, %p34_p1  ;;  %s412_s29 = sshll.u32 %s148_s27, 4 }
  0x2f   : > { %s806_s4 = scalar_lea.hbm %s910_s0, %s424_s28  ;;  %s152_s22 = scalar_lea.vmem [#allocation2], %s412_s29 }
  0x30   : > { %s160_s25 = sshll.u32 %s152_s22, 4  ;;  %p808_p11 = pnand %p513_p6, %p36_p8  ;;  %s812_s25 = int_to_ptr.vmem [resolvable:$true] %s160_s25 }
  0x31   : > { %s149_s5 = scalar_lea.sflag [#allocation3], %s148_s27  ;;  %s579_s6 = scalar_lea.hbm %s806_s4, 256 }
  0x32   : > { %p580_p13 = scmp.ne.s32.totalorder %s806_s4, %s579_s6  ;;  %p581_p0 = pneg %p808_p11 }
  0x33   : > { %s584_s9 = scalar_lea.hbm %s910_s0, 512  ;;  %p585_p7 = scmp.lt.u32.totalorder %s806_s4, %s910_s0 }
  0x34   : > { %p582_p3 = pnand %p581_p0, %p580_p13  ;;  %p586_p9 = scmp.lt.u32.totalorder %s584_s9, %s579_s6 }
  0x35   : > { %p588_p1 = scmp.lt.u32.totalorder %s579_s6, %s806_s4 }
  0x36   : > { %p583_p5 = pneg %p582_p3  ;;  %p587_p2 = por %p586_p9, %p585_p7 }
  0x38   : > { %p589_p4 = por %p588_p1, %p587_p2 }
  0x3a   : > { %p590_p6 = pnand %p589_p4, %p583_p5 }
  0x3c   : > { %593 = shalt.err (!%p590_p6)
}
  0x3d   : > { %s594_s27 = scalar_lea.vmem %s812_s25, 256  ;;  %s684_s28 = smov [#allocation2]  }
  0x3e   : > { %p595_p8 = scmp.ne.s32.totalorder %s812_s25, %s594_s27  ;;  %s599_s29 = sshll.u32 %s684_s28, 4  ;;  %s600_s29 = int_to_ptr.vmem [resolvable:$false] %s599_s29 }
  0x3f   : > { %s601_s23 = scalar_lea.vmem %s600_s29, 512  ;;  %p602_p3 = scmp.lt.s32.totalorder %s812_s25, %s600_s29 }
  0x40   : > { %p597_p10 = pnand %p595_p8, %p581_p0  ;;  %p603_p7 = scmp.lt.s32.totalorder %s601_s23, %s594_s27 }
  0x42   : > { %p598_p13 = pneg %p597_p10  ;;  %p604_p9 = por %p603_p7, %p602_p3 }
  0x44   : > { %p605_p2 = pnand %p604_p9, %p598_p13 }
  0x46   : > { %608 = shalt.err (!%p605_p2)
}
  0x47   : > { %507 = dma.hbm_to_vmem [thread:$0]  (!%p808_p11), %s806_s4, 256, %s812_s25, %s149_s5  }
  0x48   : > { %p924_p5 = scmp.ne.s32.totalorder %s919_s20, 0 }
  0x49   : > { %s842_s30 = sand.u32 (!%p924_p5), 1, %s671_s13   ;;  %p925_p0 = scmp.ne.s32.totalorder (!%p924_p5), %s917_s18, 0 }
  0x4a   : > { %169 = sbr.rel (%p924_p5) target bundleno = 351 (0x15f), region = 32  ;;  %s416_s22 = sshll.u32 (!%p924_p5), %s842_s30, 4 }
  0x4b   : > { %s172_s6 = scalar_lea.sflag (!%p924_p5), [#allocation3], %s842_s30  ;;  %s846_s7 = scalar_lea.vmem (!%p924_p5), [#allocation2], %s416_s22 }
  0x51   : > { %654 = dma.done.wait (%p925_p0), %s172_s6, 256  }
  0x52   : > { %656 = vsyncadd (%p925_p0), %s172_s6, 4294967040  ;;  %p926_p11 = scmp.eq.s32.totalorder %s727_s16, 0 }
  0x54   : > { %658 = dma.done.wait (%p926_p11), [#allocation6], 4096   ;;  %p927_p1 = pmov %p926_p11 }
  0x55   : > { %v220_v0 = vld [vmem:[#allocation5 + $0x80] sm:$0xff]  ;;  %v221_v1 = vld [vmem:[#allocation5 + $0x88] sm:$0xff]  ;;  %v222_v5 = vld [vmem:[#allocation5 + $0x90] sm:$0xff]  ;;  %s418_s18 = sshll.u32 %s842_s30, 3  ;;  %s421_s25 = sshll.u32 %s727_s16, 7 }
  0x56   : > { %660 = vsyncadd (%p927_p1), [#allocation6], 4294963200  ;;  %v204_v2 = vld [vmem:[#allocation5] sm:$0xff]  ;;  %v460_v3 = vpack.c.bf16 %v221_v1, %v220_v0  ;;  %v205_v4 = vld [vmem:[#allocation5 + $0x8] sm:$0xff]  ;;  %s201_s26 = scalar_lea.vmem [#allocation7], %s418_s18  ;;  %s866_s10 = scalar_lea.hbm %s913_s3, %s421_s25 }
  0x57   : > { %v223_v6 = vld [vmem:[#allocation5 + $0x98] sm:$0xff]  ;;  %v462_v7 = vpack.c.bf16 %v205_v4, %v204_v2  ;;  %v206_v9 = vld [vmem:[#allocation5 + $0x10] sm:$0xff]  ;;  %v224_v11 = vld [vmem:[#allocation5 + $0xa0] sm:$0xff]  ;;  %s328_s5 = sshll.u32 %s201_s26, 4  ;;  %s315_s11 = scalar_lea.sflag [#allocation4], %s842_s30  ;;  %s868_s5 = int_to_ptr.vmem [resolvable:$true] %s328_s5 }
  0x58   : > { %v464_v8 = vpack.c.bf16 %v223_v6, %v222_v5  ;;  %v207_v10 = vld [vmem:[#allocation5 + $0x18] sm:$0xff]  ;;  %461 = vmatprep.subr.bf16.mxu0 %v460_v3  ;;  %v225_v12 = vld [vmem:[#allocation5 + $0xa8] sm:$0xff]  ;;  %v208_v15 = vld [vmem:[#allocation5 + $0x20] sm:$0xff]  ;;  %s609_s27 = scalar_lea.vmem %s868_s5, 128  ;;  %s685_s16 = smov [#allocation7]  }
  0x59   : > { %463 = vmatpush3.bf16.msra.mxu0 %v462_v7  ;;  %v466_v13 = vpack.c.bf16 %v207_v10, %v206_v9  ;;  %v468_v14 = vpack.c.bf16 %v225_v12, %v224_v11  ;;  %v209_v16 = vld [vmem:[#allocation5 + $0x28] sm:$0xff]  ;;  %v226_v17 = vld [vmem:[#allocation5 + $0xb0] sm:$0xff]  ;;  %v227_v18 = vld [vmem:[#allocation5 + $0xb8] sm:$0xff]  ;;  %p610_p4 = scmp.ne.s32.totalorder %s868_s5, %s609_s27  ;;  %s613_s28 = sshll.u32 %s685_s16, 4  ;;  %s614_s28 = int_to_ptr.vmem [resolvable:$false] %s613_s28 }
  0x5a   : > { %465 = vmatprep.subr.bf16.mxu0 %v464_v8  ;;  %v470_v19 = vpack.c.bf16 %v209_v16, %v208_v15  ;;  %v472_v20 = vpack.c.bf16 %v227_v18, %v226_v17  ;;  %v210_v21 = vld [vmem:[#allocation5 + $0x30] sm:$0xff]  ;;  %v211_v22 = vld [vmem:[#allocation5 + $0x38] sm:$0xff]  ;;  %v228_v23 = vld [vmem:[#allocation5 + $0xc0] sm:$0xff]  ;;  %s615_s29 = scalar_lea.vmem %s614_s28, 256  ;;  %p616_p10 = scmp.lt.s32.totalorder %s868_s5, %s614_s28 }
  0x5b   : > { %v229_v24 = vld [vmem:[#allocation5 + $0xc8] sm:$0xff]  ;;  %v474_v26 = vpack.c.bf16 %v211_v22, %v210_v21  ;;  %v212_v28 = vld [vmem:[#allocation5 + $0x40] sm:$0xff]  ;;  %v230_v30 = vld [vmem:[#allocation5 + $0xd0] sm:$0xff]  ;;  %p611_p6 = pnand %p610_p4, %p797_p12  ;;  %p617_p13 = scmp.lt.s32.totalorder %s615_s29, %s609_s27 }
  0x5c   : > { %v203_v25 = vld [vmem:[%s846_s7 + $0x8] sm:$0xff]  ;;  %v476_v27 = vpack.c.bf16 %v229_v24, %v228_v23  ;;  %v214_v34 = vld [vmem:[#allocation5 + $0x50] sm:$0xff]  ;;  %v232_v36 = vld [vmem:[#allocation5 + $0xe0] sm:$0xff] }
  0x5d   : > { %467 = vmatpush3.bf16.msra.mxu0 %v466_v13  ;;  %307 = vmatprep.mubr.f32.mxu0 %v203_v25  ;;  %v213_v29 = vld [vmem:[#allocation5 + $0x48] sm:$0xff]  ;;  %v231_v31 = vld [vmem:[#allocation5 + $0xd8] sm:$0xff]  ;;  %v216_v40 = vld [vmem:[#allocation5 + $0x60] sm:$0xff]  ;;  %p612_p8 = pneg %p611_p6  ;;  %p618_p3 = por %p617_p13, %p616_p10 }
  0x5e   : > { %469 = vmatprep.subr.bf16.mxu0 %v468_v14  ;;  %v478_v32 = vpack.c.bf16 %v213_v29, %v212_v28  ;;  %v480_v33 = vpack.c.bf16 %v231_v31, %v230_v30  ;;  %v215_v35 = vld [vmem:[#allocation5 + $0x58] sm:$0xff]  ;;  %v233_v37 = vld [vmem:[#allocation5 + $0xe8] sm:$0xff]  ;;  %v234_v42 = vld [vmem:[#allocation5 + $0xf0] sm:$0xff] }
  0x5f   : > { %v482_v38 = vpack.c.bf16 %v215_v35, %v214_v34  ;;  %v484_v39 = vpack.c.bf16 %v233_v37, %v232_v36  ;;  %v217_v41 = vld [vmem:[#allocation5 + $0x68] sm:$0xff]  ;;  %v235_v43 = vld [vmem:[#allocation5 + $0xf8] sm:$0xff]  ;;  %v218_v46 = vld [vmem:[#allocation5 + $0x70] sm:$0xff]  ;;  %p619_p7 = pnand %p618_p3, %p612_p8 }
  0x60   : > { %v486_v44 = vpack.c.bf16 %v217_v41, %v216_v40  ;;  %v488_v45 = vpack.c.bf16 %v235_v43, %v234_v42  ;;  %v219_v47 = vld [vmem:[#allocation5 + $0x78] sm:$0xff]  ;;  %v202_v49 = vld [vmem:[%s846_s7] sm:$0xff] }
  0x61   : > { %471 = vmatpush3.bf16.msra.mxu0 %v470_v19  ;;  %v490_v48 = vpack.c.bf16 %v219_v47, %v218_v46  ;;  %v419_v51 = vld [vmem:[%s912_s2] ss:$0 sm:$0xff] }
  0x62   : > { %473 = vmatprep.subr.bf16.mxu0 %v472_v20 }
  0x65   : > { %475 = vmatpush3.bf16.msra.mxu0 %v474_v26 }
  0x66   : > { %477 = vmatprep.subr.bf16.mxu0 %v476_v27 }
  0x69   : > { %479 = vmatpush3.bf16.msra.mxu0 %v478_v32 }
  0x6a   : > { %481 = vmatprep.subr.bf16.mxu0 %v480_v33 }
  0x6d   : > { %483 = vmatpush3.bf16.msra.mxu0 %v482_v38 }
  0x6e   : > { %485 = vmatprep.subr.bf16.mxu0 %v484_v39 }
  0x71   : > { %487 = vmatpush3.bf16.msra.mxu0 %v486_v44 }
  0x72   : > { %489 = vmatprep.subr.bf16.mxu0 %v488_v45 }
  0x75   : > { %491 = vmatpush3.bf16.msra.mxu0 %v490_v48 }
  0x78   : > { %308 = vmatmul.mubr.f32.vlgmr.msra.gmra.mrb[0].mxu0 %v202_v49 }
 0x14b   : > { %v457_v50 = vpop.f32.mrb[0].mxu0 }
 0x14c   : > { %v458_v52 = vpop.f32.mrb[1].mxu0 }
 0x14d   : > { %v459_v53 = vadd.f32 %v458_v52, %v457_v50 }
 0x14f   : > { %v310_v54 = vadd.f32 %v459_v53, %v419_v51 }
 0x151   : > { %313 = vst [vmem:[%s201_s26] sm:$0xff] %v310_v54 }
 0x152   : > { %622 = shalt.err (!%p619_p7)
}
 0x153   : > { %s623_s23 = scalar_lea.hbm %s866_s10, 128  ;;  %s627_s6 = scalar_lea.hbm %s913_s3, 256 }
 0x154   : > { %p624_p9 = scmp.ne.s32.totalorder %s866_s10, %s623_s23  ;;  %p628_p0 = scmp.lt.u32.totalorder %s866_s10, %s913_s3 }
 0x155   : > { %p629_p11 = scmp.lt.u32.totalorder %s627_s6, %s623_s23  ;;  %p631_p4 = scmp.lt.u32.totalorder %s623_s23, %s866_s10 }
 0x156   : > { %p625_p2 = pnand %p624_p9, %p797_p12 }
 0x157   : > { %p630_p1 = por %p629_p11, %p628_p0 }
 0x158   : > { %p626_p5 = pneg %p625_p2 }
 0x159   : > { %p632_p6 = por %p631_p4, %p630_p1 }
 0x15b   : > { %p633_p8 = pnand %p632_p6, %p626_p5 }
 0x15d   : > { %636 = shalt.err (!%p633_p8)
}
 0x15e   : > { %498 = dma.vmem_to_hbm [thread:$0]  (%p797_p12), %s868_s5, 128, %s866_s10, %s315_s11  }
 0x15f PF: > { %s340_s20 = sand.u32 1, %s667_s12   ;;  %p928_p10 = scmp.ne.s32.totalorder %s918_s19, 0 }
 0x160   : > { %p929_p13 = scmp.ge.s32.totalorder %s679_s15, 2  ;;  %s341_s4 = scalar_lea.sflag [#allocation4], %s340_s20 }
 0x162   : > { %p509_p3 = pnand %p929_p13, %p928_p10 }
 0x164   : > { %662 = dma.done.wait (!%p509_p3), %s341_s4, 128  }
 0x165   : > { %664 = vsyncadd (!%p509_p3), %s341_s4, 4294967168  ;;  %p17_p7 = scmp.ge.s32.totalorder %s762_s24, 4   ;;  %s930_s12 = smov %s671_s13 }
 0x166   : > { %s931_s13 = smov %s675_s14  ;;  %s932_s14 = smov %s793_s17 }
 0x167   : > { %s933_s15 = smov %s762_s24  ;;  %19 = sbr.rel (!%p17_p7) target bundleno = 6 (0x6), region = 81 }
 0x16e   :  { %346 = vsyncpa [#allocation3], 1 }
 0x16f   :  { %348 = vsyncpa [#allocation3 + $0x1], 1 }
 0x170   :  { %349 = vsyncpa [#allocation6], 1 }
 0x171   :  { %350 = vsyncpa [#allocation4], 1 }
 0x172   :  { %352 = vsyncpa [#allocation4 + $0x1], 1 }

// kernel: tpu_custom_call.1
= control target key start
LH: loop header
LB: loop body
LE: loop exit
PB: predicated region body
PF: predicated region fallthrough
CT: control target
= control target key end

     0   :  { %8 = vsyncpa [#allocation3], 0  ;;  %s910_s0 = inlined_call_operand.hbm [shape: f32[16,256], index: 0, kind: input, shape index: {}]   ;;  %s911_s1 = inlined_call_operand.hbm [shape: f32[256,128], index: 1, kind: input, shape index: {}]   ;;  %s912_s2 = inlined_call_operand.vmem [shape: f32[1,128], index: 2, kind: input, shape index: {}]   ;;  %s913_s3 = inlined_call_operand.hbm [shape: f32[16,128], index: 3, kind: output, shape index: {}]  }
   0x1   :  { %10 = vsyncpa [#allocation3 + $0x1], 0 }
   0x2   :  { %11 = vsyncpa [#allocation6], 0 }
   0x3   :  { %12 = vsyncpa [#allocation4], 0 }
   0x4   :  { %14 = vsyncpa [#allocation4 + $0x1], 0  ;;  %s706_s12 = smov 0   ;;  %s708_s13 = smov 0  }
   0x5   :  { %s710_s14 = smov 0   ;;  %s712_s15 = smov 0  }
   0x6 LB: > { %s727_s16 = sadd.s32 4294967295, %s679_s15   ;;  %s408_s17 = sadd.s32 4294967294, %s679_s15   ;;  %s679_s15 = sphi %s712_s15, %s933_s15   ;;  %s675_s14 = sphi %s710_s14, %s932_s14   ;;  %s671_s13 = sphi %s708_s13, %s931_s13   ;;  %s667_s12 = sphi %s706_s12, %s930_s12  }
   0x7   : > { %p40_p0 = scmp.ne.s32.totalorder %s671_s13, %s667_s12  ;;  %p914_p1 = scmp.eq.s32.totalorder %s727_s16, 0 }
   0x8   : > { %p112_p3 = scmp.eq.s32.totalorder %s408_s17, 1  ;;  %p409_p5 = scmp.ge.s32.totalorder %s679_s15, 1 }
   0x9   : > { %p736_p4 = por %p914_p1, %p40_p0  ;;  %p119_p7 = scmp.lt.s32.totalorder %s679_s15, 3 }
   0xa   : > { %p741_p6 = por %p112_p3, %p40_p0  ;;  %s681_s21 = smov [#allocation5]  }
   0xb   : > { %s917_s18 = scalar_select %p736_p4, 1, 0 }
   0xc   : > { %s918_s19 = scalar_select %p741_p6, 1, 0 }
   0xd   : > { %p746_p8 = pnand %p409_p5, %p119_p7  ;;  %s131_s22 = sshll.u32 %s681_s21, 4  ;;  %s750_s22 = int_to_ptr.vmem [resolvable:$true] %s131_s22 }
   0xe   : > { %s762_s24 = sadd.s32 1, %s679_s15   ;;  %s27_s25 = sadd.s32 1, %s675_s14 }
   0xf   : > { %s919_s20 = scalar_select %p746_p8, 1, 0 }
  0x10   : > { %p500_p9 = pneg %p746_p8  ;;  %s24_s26 = ssub.s32 %s679_s15, %s762_s24 }
  0x11   : > { %s551_s29 = scalar_lea.hbm %s911_s1, 4096 }
  0x12   : > { %p757_p11 = pnand %p500_p9, %p914_p1  ;;  %p552_p12 = scmp.ne.s32.totalorder %s911_s1, %s551_s29 }
  0x13   : > { %p558_p5 = scmp.lt.u32.totalorder %s551_s29, %s911_s1 }
  0x14   : > { %p553_p13 = pneg %p757_p11 }
  0x16   : > { %p554_p0 = pnand %p553_p13, %p552_p12 }
  0x18   : > { %p555_p3 = pneg %p554_p0 }
  0x1a   : > { %p560_p7 = pnand %p558_p5, %p555_p3 }
  0x1c   : > { %563 = shalt.err (!%p560_p7)
}
  0x1d   : > { %s564_s7 = scalar_lea.vmem %s750_s22, 4096  ;;  %p572_p2 = scmp.lt.s32.totalorder %s750_s22, %s750_s22 }
  0x1e   : > { %p565_p9 = scmp.ne.s32.totalorder %s750_s22, %s564_s7  ;;  %p573_p6 = scmp.lt.s32.totalorder %s564_s7, %s564_s7 }
  0x20   : > { %p567_p10 = pnand %p565_p9, %p553_p13  ;;  %p574_p4 = por %p573_p6, %p572_p2 }
  0x22   : > { %p568_p1 = pneg %p567_p10 }
  0x24   : > { %p575_p8 = pnand %p574_p4, %p568_p1 }
  0x26   : > { %578 = shalt.err (!%p575_p8)
}
  0x27   : > { %s682_s8 = smov 128   ;;  %s683_s9 = smov 8  }
  0x28   : > { %503 = dma.hbm_to_vmem [thread:$0]  (!%p757_p11), %s911_s1, 4096, %s750_s22, [#allocation6], %s682_s8, %s682_s8, %s683_s9  }
  0x29   : > { %p25_p2 = scmp.eq.s32.totalorder %s24_s26, 0  ;;  %p34_p1 = scmp.ne.s32.totalorder %s675_s14, %s671_s13 }
  0x2a   : > { %p35_p4 = scmp.eq.s32.totalorder %s679_s15, 0  ;;  %p513_p6 = scmp.lt.s32.totalorder %s679_s15, 2 }
  0x2b   : > { %s793_s17 = scalar_select %p25_p2, %s675_s14, %s27_s25  }
  0x2c   : > { %p36_p8 = por %p35_p4, %p34_p1  ;;  %p921_p10 = scmp.eq.s32.totalorder %s727_s16, 1 }
  0x2d   : > { %s148_s27 = sand.u32 1, %s675_s14   ;;  %s424_s28 = sshll.u32 %s679_s15, 8 }
  0x2e   : > { %p797_p12 = por %p921_p10, %p34_p1  ;;  %s412_s29 = sshll.u32 %s148_s27, 4 }
  0x2f   : > { %s806_s4 = scalar_lea.hbm %s910_s0, %s424_s28  ;;  %s152_s22 = scalar_lea.vmem [#allocation2], %s412_s29 }
  0x30   : > { %s160_s25 = sshll.u32 %s152_s22, 4  ;;  %p808_p11 = pnand %p513_p6, %p36_p8  ;;  %s812_s25 = int_to_ptr.vmem [resolvable:$true] %s160_s25 }
  0x31   : > { %s149_s5 = scalar_lea.sflag [#allocation3], %s148_s27  ;;  %s579_s6 = scalar_lea.hbm %s806_s4, 256 }
  0x32   : > { %p580_p13 = scmp.ne.s32.totalorder %s806_s4, %s579_s6  ;;  %p581_p0 = pneg %p808_p11 }
  0x33   : > { %s584_s9 = scalar_lea.hbm %s910_s0, 512  ;;  %p585_p7 = scmp.lt.u32.totalorder %s806_s4, %s910_s0 }
  0x34   : > { %p582_p3 = pnand %p581_p0, %p580_p13  ;;  %p586_p9 = scmp.lt.u32.totalorder %s584_s9, %s579_s6 }
  0x35   : > { %p588_p1 = scmp.lt.u32.totalorder %s579_s6, %s806_s4 }
  0x36   : > { %p583_p5 = pneg %p582_p3  ;;  %p587_p2 = por %p586_p9, %p585_p7 }
  0x38   : > { %p589_p4 = por %p588_p1, %p587_p2 }
  0x3a   : > { %p590_p6 = pnand %p589_p4, %p583_p5 }
  0x3c   : > { %593 = shalt.err (!%p590_p6)
}
  0x3d   : > { %s594_s27 = scalar_lea.vmem %s812_s25, 256  ;;  %s684_s28 = smov [#allocation2]  }
  0x3e   : > { %p595_p8 = scmp.ne.s32.totalorder %s812_s25, %s594_s27  ;;  %s599_s29 = sshll.u32 %s684_s28, 4  ;;  %s600_s29 = int_to_ptr.vmem [resolvable:$false] %s599_s29 }
  0x3f   : > { %s601_s23 = scalar_lea.vmem %s600_s29, 512  ;;  %p602_p3 = scmp.lt.s32.totalorder %s812_s25, %s600_s29 }
  0x40   : > { %p597_p10 = pnand %p595_p8, %p581_p0  ;;  %p603_p7 = scmp.lt.s32.totalorder %s601_s23, %s594_s27 }
  0x42   : > { %p598_p13 = pneg %p597_p10  ;;  %p604_p9 = por %p603_p7, %p602_p3 }
  0x44   : > { %p605_p2 = pnand %p604_p9, %p598_p13 }
  0x46   : > { %608 = shalt.err (!%p605_p2)
}
  0x47   : > { %507 = dma.hbm_to_vmem [thread:$0]  (!%p808_p11), %s806_s4, 256, %s812_s25, %s149_s5  }
  0x48   : > { %p924_p5 = scmp.ne.s32.totalorder %s919_s20, 0 }
  0x49   : > { %s842_s30 = sand.u32 (!%p924_p5), 1, %s671_s13   ;;  %p925_p0 = scmp.ne.s32.totalorder (!%p924_p5), %s917_s18, 0 }
  0x4a   : > { %169 = sbr.rel (%p924_p5) target bundleno = 351 (0x15f), region = 32  ;;  %s416_s22 = sshll.u32 (!%p924_p5), %s842_s30, 4 }
  0x4b   : > { %s172_s6 = scalar_lea.sflag (!%p924_p5), [#allocation3], %s842_s30  ;;  %s846_s7 = scalar_lea.vmem (!%p924_p5), [#allocation2], %s416_s22 }
  0x51   : > { %654 = dma.done.wait (%p925_p0), %s172_s6, 256  }
  0x52   : > { %656 = vsyncadd (%p925_p0), %s172_s6, 4294967040  ;;  %p926_p11 = scmp.eq.s32.totalorder %s727_s16, 0 }
  0x54   : > { %658 = dma.done.wait (%p926_p11), [#allocation6], 4096   ;;  %p927_p1 = pmov %p926_p11 }
  0x55   : > { %v220_v0 = vld [vmem:[#allocation5 + $0x80] sm:$0xff]  ;;  %v221_v1 = vld [vmem:[#allocation5 + $0x88] sm:$0xff]  ;;  %v222_v5 = vld [vmem:[#allocation5 + $0x90] sm:$0xff]  ;;  %s418_s18 = sshll.u32 %s842_s30, 3  ;;  %s421_s25 = sshll.u32 %s727_s16, 7 }
  0x56   : > { %660 = vsyncadd (%p927_p1), [#allocation6], 4294963200  ;;  %v204_v2 = vld [vmem:[#allocation5] sm:$0xff]  ;;  %v460_v3 = vpack.c.bf16 %v221_v1, %v220_v0  ;;  %v205_v4 = vld [vmem:[#allocation5 + $0x8] sm:$0xff]  ;;  %s201_s26 = scalar_lea.vmem [#allocation7], %s418_s18  ;;  %s866_s10 = scalar_lea.hbm %s913_s3, %s421_s25 }
  0x57   : > { %v223_v6 = vld [vmem:[#allocation5 + $0x98] sm:$0xff]  ;;  %v462_v7 = vpack.c.bf16 %v205_v4, %v204_v2  ;;  %v206_v9 = vld [vmem:[#allocation5 + $0x10] sm:$0xff]  ;;  %v224_v11 = vld [vmem:[#allocation5 + $0xa0] sm:$0xff]  ;;  %s328_s5 = sshll.u32 %s201_s26, 4  ;;  %s315_s11 = scalar_lea.sflag [#allocation4], %s842_s30  ;;  %s868_s5 = int_to_ptr.vmem [resolvable:$true] %s328_s5 }
  0x58   : > { %v464_v8 = vpack.c.bf16 %v223_v6, %v222_v5  ;;  %v207_v10 = vld [vmem:[#allocation5 + $0x18] sm:$0xff]  ;;  %461 = vmatprep.subr.bf16.mxu0 %v460_v3  ;;  %v225_v12 = vld [vmem:[#allocation5 + $0xa8] sm:$0xff]  ;;  %v208_v15 = vld [vmem:[#allocation5 + $0x20] sm:$0xff]  ;;  %s609_s27 = scalar_lea.vmem %s868_s5, 128  ;;  %s685_s16 = smov [#allocation7]  }
  0x59   : > { %463 = vmatpush3.bf16.msra.mxu0 %v462_v7  ;;  %v466_v13 = vpack.c.bf16 %v207_v10, %v206_v9  ;;  %v468_v14 = vpack.c.bf16 %v225_v12, %v224_v11  ;;  %v209_v16 = vld [vmem:[#allocation5 + $0x28] sm:$0xff]  ;;  %v226_v17 = vld [vmem:[#allocation5 + $0xb0] sm:$0xff]  ;;  %v227_v18 = vld [vmem:[#allocation5 + $0xb8] sm:$0xff]  ;;  %p610_p4 = scmp.ne.s32.totalorder %s868_s5, %s609_s27  ;;  %s613_s28 = sshll.u32 %s685_s16, 4  ;;  %s614_s28 = int_to_ptr.vmem [resolvable:$false] %s613_s28 }
  0x5a   : > { %465 = vmatprep.subr.bf16.mxu0 %v464_v8  ;;  %v470_v19 = vpack.c.bf16 %v209_v16, %v208_v15  ;;  %v472_v20 = vpack.c.bf16 %v227_v18, %v226_v17  ;;  %v210_v21 = vld [vmem:[#allocation5 + $0x30] sm:$0xff]  ;;  %v211_v22 = vld [vmem:[#allocation5 + $0x38] sm:$0xff]  ;;  %v228_v23 = vld [vmem:[#allocation5 + $0xc0] sm:$0xff]  ;;  %s615_s29 = scalar_lea.vmem %s614_s28, 256  ;;  %p616_p10 = scmp.lt.s32.totalorder %s868_s5, %s614_s28 }
  0x5b   : > { %v229_v24 = vld [vmem:[#allocation5 + $0xc8] sm:$0xff]  ;;  %v474_v26 = vpack.c.bf16 %v211_v22, %v210_v21  ;;  %v212_v28 = vld [vmem:[#allocation5 + $0x40] sm:$0xff]  ;;  %v230_v30 = vld [vmem:[#allocation5 + $0xd0] sm:$0xff]  ;;  %p611_p6 = pnand %p610_p4, %p797_p12  ;;  %p617_p13 = scmp.lt.s32.totalorder %s615_s29, %s609_s27 }
  0x5c   : > { %v203_v25 = vld [vmem:[%s846_s7 + $0x8] sm:$0xff]  ;;  %v476_v27 = vpack.c.bf16 %v229_v24, %v228_v23  ;;  %v214_v34 = vld [vmem:[#allocation5 + $0x50] sm:$0xff]  ;;  %v232_v36 = vld [vmem:[#allocation5 + $0xe0] sm:$0xff] }
  0x5d   : > { %467 = vmatpush3.bf16.msra.mxu0 %v466_v13  ;;  %307 = vmatprep.mubr.f32.mxu0 %v203_v25  ;;  %v213_v29 = vld [vmem:[#allocation5 + $0x48] sm:$0xff]  ;;  %v231_v31 = vld [vmem:[#allocation5 + $0xd8] sm:$0xff]  ;;  %v216_v40 = vld [vmem:[#allocation5 + $0x60] sm:$0xff]  ;;  %p612_p8 = pneg %p611_p6  ;;  %p618_p3 = por %p617_p13, %p616_p10 }
  0x5e   : > { %469 = vmatprep.subr.bf16.mxu0 %v468_v14  ;;  %v478_v32 = vpack.c.bf16 %v213_v29, %v212_v28  ;;  %v480_v33 = vpack.c.bf16 %v231_v31, %v230_v30  ;;  %v215_v35 = vld [vmem:[#allocation5 + $0x58] sm:$0xff]  ;;  %v233_v37 = vld [vmem:[#allocation5 + $0xe8] sm:$0xff]  ;;  %v234_v42 = vld [vmem:[#allocation5 + $0xf0] sm:$0xff] }
  0x5f   : > { %v482_v38 = vpack.c.bf16 %v215_v35, %v214_v34  ;;  %v484_v39 = vpack.c.bf16 %v233_v37, %v232_v36  ;;  %v217_v41 = vld [vmem:[#allocation5 + $0x68] sm:$0xff]  ;;  %v235_v43 = vld [vmem:[#allocation5 + $0xf8] sm:$0xff]  ;;  %v218_v46 = vld [vmem:[#allocation5 + $0x70] sm:$0xff]  ;;  %p619_p7 = pnand %p618_p3, %p612_p8 }
  0x60   : > { %v486_v44 = vpack.c.bf16 %v217_v41, %v216_v40  ;;  %v488_v45 = vpack.c.bf16 %v235_v43, %v234_v42  ;;  %v219_v47 = vld [vmem:[#allocation5 + $0x78] sm:$0xff]  ;;  %v202_v49 = vld [vmem:[%s846_s7] sm:$0xff] }
  0x61   : > { %471 = vmatpush3.bf16.msra.mxu0 %v470_v19  ;;  %v490_v48 = vpack.c.bf16 %v219_v47, %v218_v46  ;;  %v419_v51 = vld [vmem:[%s912_s2] ss:$0 sm:$0xff] }
  0x62   : > { %473 = vmatprep.subr.bf16.mxu0 %v472_v20 }
  0x65   : > { %475 = vmatpush3.bf16.msra.mxu0 %v474_v26 }
  0x66   : > { %477 = vmatprep.subr.bf16.mxu0 %v476_v27 }
  0x69   : > { %479 = vmatpush3.bf16.msra.mxu0 %v478_v32 }
  0x6a   : > { %481 = vmatprep.subr.bf16.mxu0 %v480_v33 }
  0x6d   : > { %483 = vmatpush3.bf16.msra.mxu0 %v482_v38 }
  0x6e   : > { %485 = vmatprep.subr.bf16.mxu0 %v484_v39 }
  0x71   : > { %487 = vmatpush3.bf16.msra.mxu0 %v486_v44 }
  0x72   : > { %489 = vmatprep.subr.bf16.mxu0 %v488_v45 }
  0x75   : > { %491 = vmatpush3.bf16.msra.mxu0 %v490_v48 }
  0x78   : > { %308 = vmatmul.mubr.f32.vlgmr.msra.gmra.mrb[0].mxu0 %v202_v49 }
 0x14b   : > { %v457_v50 = vpop.f32.mrb[0].mxu0 }
 0x14c   : > { %v458_v52 = vpop.f32.mrb[1].mxu0 }
 0x14d   : > { %v459_v53 = vadd.f32 %v458_v52, %v457_v50 }
 0x14f   : > { %v310_v54 = vadd.f32 %v459_v53, %v419_v51 }
 0x151   : > { %313 = vst [vmem:[%s201_s26] sm:$0xff] %v310_v54 }
 0x152   : > { %622 = shalt.err (!%p619_p7)
}
 0x153   : > { %s623_s23 = scalar_lea.hbm %s866_s10, 128  ;;  %s627_s6 = scalar_lea.hbm %s913_s3, 256 }
 0x154   : > { %p624_p9 = scmp.ne.s32.totalorder %s866_s10, %s623_s23  ;;  %p628_p0 = scmp.lt.u32.totalorder %s866_s10, %s913_s3 }
 0x155   : > { %p629_p11 = scmp.lt.u32.totalorder %s627_s6, %s623_s23  ;;  %p631_p4 = scmp.lt.u32.totalorder %s623_s23, %s866_s10 }
 0x156   : > { %p625_p2 = pnand %p624_p9, %p797_p12 }
 0x157   : > { %p630_p1 = por %p629_p11, %p628_p0 }
 0x158   : > { %p626_p5 = pneg %p625_p2 }
 0x159   : > { %p632_p6 = por %p631_p4, %p630_p1 }
 0x15b   : > { %p633_p8 = pnand %p632_p6, %p626_p5 }
 0x15d   : > { %636 = shalt.err (!%p633_p8)
}
 0x15e   : > { %498 = dma.vmem_to_hbm [thread:$0]  (%p797_p12), %s868_s5, 128, %s866_s10, %s315_s11  }
 0x15f PF: > { %s340_s20 = sand.u32 1, %s667_s12   ;;  %p928_p10 = scmp.ne.s32.totalorder %s918_s19, 0 }
 0x160   : > { %p929_p13 = scmp.ge.s32.totalorder %s679_s15, 2  ;;  %s341_s4 = scalar_lea.sflag [#allocation4], %s340_s20 }
 0x162   : > { %p509_p3 = pnand %p929_p13, %p928_p10 }
 0x164   : > { %662 = dma.done.wait (!%p509_p3), %s341_s4, 128  }
 0x165   : > { %664 = vsyncadd (!%p509_p3), %s341_s4, 4294967168  ;;  %p17_p7 = scmp.ge.s32.totalorder %s762_s24, 4   ;;  %s930_s12 = smov %s671_s13 }
 0x166   : > { %s931_s13 = smov %s675_s14  ;;  %s932_s14 = smov %s793_s17 }
 0x167   : > { %s933_s15 = smov %s762_s24  ;;  %19 = sbr.rel (!%p17_p7) target bundleno = 6 (0x6), region = 81 }
 0x16e   :  { %346 = vsyncpa [#allocation3], 1 }
 0x16f   :  { %348 = vsyncpa [#allocation3 + $0x1], 1 }
 0x170   :  { %349 = vsyncpa [#allocation6], 1 }
 0x171   :  { %350 = vsyncpa [#allocation4], 1 }
 0x172   :  { %352 = vsyncpa [#allocation4 + $0x1], 1 }

</bundles_post_ra>
